<compile_context>
chip_gen: v6e
topology: v6e:2x2x1
jax: 0.10.0
libtpu: 0.0.40
codegen_flags: <defaults>
</compile_context>

<pallas_src>
import functools
import math

import jax
import jax.numpy as jnp
from jax.experimental import pallas as pl
from jax.experimental.pallas import tpu as pltpu

# ----------------------------- problem sizes ------------------------------
OBS_SIZE = 24
ACT_SIZE = 8
HIDDEN = 32
NUM_HIDDEN_LAYERS = 3           # fixed by MLP default
BATCH = 8                       # small demo batch (multiple of 8 sublanes)

IN_SIZE = OBS_SIZE + ACT_SIZE   # MLP input size (state ++ action)
H2 = 2 * HIDDEN                 # both twin nets fused along the lane axis
LANE_BLK = 128                  # per-layer lane block (vreg-aligned)
PRE_COLS = (NUM_HIDDEN_LAYERS + 1) * LANE_BLK     # 4 * 128 = 512
A_ROWS = IN_SIZE + 1                              # state + action + bias row
B_ROWS = (NUM_HIDDEN_LAYERS + 1) * LANE_BLK + 1   # 3 hidden + out head + bias


# ------------------------------- kernel -----------------------------------
def critic_kernel(state_ref, action_ref, slab_a_ref, slab_b_ref, q_ref):
    """Fused twin-Q forward for one batch tile.

    state_ref  : (TB, OBS)        raw state
    action_ref : (TB, ACT)        raw action
    slab_a_ref : (33, 512)        rows 0:24 state part, 24:32 action part,
                                  32 bias, of [W_in | Wi_0 | Wi_1 | Wi_2]
                                  (twin-fused, 128-lane padded per block)
    slab_b_ref : (513, 128)       rows l*128:(l+1)*128 = block-diag hidden
                                  weight l; rows 384:512 = output head;
                                  row 512 = output bias (all zero-padded)
    q_ref      : (TB, 2)          col 0 = Q1, col 1 = Q2
    """
    # Hoisted, off-critical-path precompute of every input-dependent term.
    pre = (jnp.dot(state_ref[...], slab_a_ref[:OBS_SIZE, :],
                   preferred_element_type=jnp.float32)
           + jnp.dot(action_ref[...], slab_a_ref[OBS_SIZE:IN_SIZE, :],
                     preferred_element_type=jnp.float32)
           + slab_a_ref[IN_SIZE:IN_SIZE + 1, :])                 # (TB, 512)

    # x = relu(linear_in(inp)) -- both nets side by side in lanes [0:64),
    # lanes [64:128) are exact zeros.
    x = jnp.maximum(pre[:, :LANE_BLK], 0.0)                      # (TB, 128)

    # Dense-connection hidden stack: only x @ Wx stays on the serial chain.
    for l in range(NUM_HIDDEN_LAYERS):
        w = slab_b_ref[l * LANE_BLK:(l + 1) * LANE_BLK, :]       # (128, 128)
        h = jnp.dot(x, w, preferred_element_type=jnp.float32)
        x = jnp.maximum(
            h + pre[:, (l + 1) * LANE_BLK:(l + 2) * LANE_BLK], 0.0)

    # Block-diagonal output head (+ bias row folded into the slab).
    w_out = slab_b_ref[NUM_HIDDEN_LAYERS * LANE_BLK:
                       (NUM_HIDDEN_LAYERS + 1) * LANE_BLK, :]    # (128, 128)
    b_out = slab_b_ref[(NUM_HIDDEN_LAYERS + 1) * LANE_BLK:
                       (NUM_HIDDEN_LAYERS + 1) * LANE_BLK + 1, :]  # (1, 128)
    q = jnp.dot(x, w_out, preferred_element_type=jnp.float32) + b_out
    q_ref[...] = q[:, :2]


# ------------------------------ wrapper ------------------------------------
def _round_up(x, m):
    return ((x + m - 1) // m) * m


@functools.partial(jax.jit, static_argnames=("batch_tile",))
def critic_forward(state, action, slab_a, slab_b, *, batch_tile=128):
    """Twin-Q forward. state: (B, obs), action: (B, act) [or (B,)]."""
    if action.ndim == 1:
        action = action[:, None]
    state = state.astype(jnp.float32)
    action = action.astype(jnp.float32)

    B = state.shape[0]
    TB = min(batch_tile, _round_up(B, 8))       # batch tile (multiple of 8)
    B_pad = _round_up(B, TB)
    if B_pad != B:
        state = jnp.pad(state, ((0, B_pad - B), (0, 0)))
        action = jnp.pad(action, ((0, B_pad - B), (0, 0)))

    q = pl.pallas_call(
        critic_kernel,
        out_shape=jax.ShapeDtypeStruct((B_pad, 2), jnp.float32),
        grid_spec=pltpu.PrefetchScalarGridSpec(
            num_scalar_prefetch=0,
            grid=(B_pad // TB,),
            in_specs=[
                pl.BlockSpec((TB, OBS_SIZE), lambda i: (i, 0)),
                pl.BlockSpec((TB, ACT_SIZE), lambda i: (i, 0)),
                pl.BlockSpec((A_ROWS, PRE_COLS), lambda i: (0, 0)),
                pl.BlockSpec((B_ROWS, LANE_BLK), lambda i: (0, 0)),
            ],
            out_specs=pl.BlockSpec((TB, 2), lambda i: (i, 0)),
        ),
        compiler_params=pltpu.CompilerParams(
            dimension_semantics=("parallel",)),
    )(state, action, slab_a, slab_b)

    return q[:B, 0:1], q[:B, 1:2]


# -------------------------- parameter init ---------------------------------
def _linear_params(key, fan_in, fan_out):
    """PyTorch nn.Linear default init; W returned transposed to (in, out)."""
    bound = 1.0 / math.sqrt(fan_in)
    kw, kb = jax.random.split(key)
    w = jax.random.uniform(kw, (fan_in, fan_out), jnp.float32, -bound, bound)
    b = jax.random.uniform(kb, (fan_out,), jnp.float32, -bound, bound)
    return w, b


def init_critic_params(key):
    """Per-net parameters in PyTorch layout (weights stored as (in, out))."""
    nets = []
    for _ in range(2):
        key, k_in, k_out = jax.random.split(key, 3)
        w_in, b_in = _linear_params(k_in, IN_SIZE, HIDDEN)
        w_h, b_h = [], []
        for _ in range(NUM_HIDDEN_LAYERS):
            key, k_h = jax.random.split(key)
            w, b = _linear_params(k_h, HIDDEN + IN_SIZE, HIDDEN)
            w_h.append(w)
            b_h.append(b)
        w_out, b_out = _linear_params(k_out, HIDDEN, 1)
        nets.append(dict(w_in=w_in, b_in=b_in, w_h=w_h, b_h=b_h,
                         w_out=w_out, b_out=b_out))
    return nets


def fuse_params(nets):
    """Build the two packed weight slabs consumed by the kernel."""
    L, H = NUM_HIDDEN_LAYERS, HIDDEN
    pad_lanes = LANE_BLK - H2                      # 64 zero-padding lanes

    # ------------------ slab A: (IN_SIZE + 1, 4*128) -----------------------
    w_blocks, b_blocks = [], []
    # block 0: linear_in (twin-fused over lanes, padded to 128)
    w0 = jnp.concatenate([nets[0]["w_in"], nets[1]["w_in"]], axis=1)
    b0 = jnp.concatenate([nets[0]["b_in"], nets[1]["b_in"]])
    w_blocks.append(jnp.pad(w0, ((0, 0), (0, pad_lanes))))
    b_blocks.append(jnp.pad(b0, (0, pad_lanes)))
    # blocks 1..L: the `inp`-rows (dense connection) of each hidden layer
    for l in range(L):
        wl = jnp.concatenate(
            [nets[0]["w_h"][l][H:], nets[1]["w_h"][l][H:]], axis=1)
        bl = jnp.concatenate([nets[0]["b_h"][l], nets[1]["b_h"][l]])
        w_blocks.append(jnp.pad(wl, ((0, 0), (0, pad_lanes))))
        b_blocks.append(jnp.pad(bl, (0, pad_lanes)))
    w_big = jnp.concatenate(w_blocks, axis=1)            # (32, 512)
    b_big = jnp.concatenate(b_blocks)[None, :]           # (1, 512)
    slab_a = jnp.concatenate([w_big, b_big], axis=0)     # (33, 512)

    # ------------------ slab B: ((L+1)*128 + 1, 128) -----------------------
    def block_diag(w1, w2):
        zero = jnp.zeros((H, H), jnp.float32)
        top = jnp.concatenate([w1, zero], axis=1)
        bot = jnp.concatenate([zero, w2], axis=1)
        return jnp.concatenate([top, bot], axis=0)       # (64, 64)

    b_rows = []
    for l in range(L):
        bd = block_diag(nets[0]["w_h"][l][:H], nets[1]["w_h"][l][:H])
        b_rows.append(jnp.pad(bd, ((0, LANE_BLK - H2), (0, LANE_BLK - H2))))
    # output head: rows 0:32 col 0 = net1 w_out, rows 32:64 col 1 = net2 w_out
    w_out = jnp.zeros((LANE_BLK, LANE_BLK), jnp.float32)
    w_out = w_out.at[:H, 0].set(nets[0]["w_out"][:, 0])
    w_out = w_out.at[H:H2, 1].set(nets[1]["w_out"][:, 0])
    b_rows.append(w_out)
    # output bias row
    b_out = jnp.zeros((1, LANE_BLK), jnp.float32)
    b_out = b_out.at[0, 0].set(nets[0]["b_out"][0])
    b_out = b_out.at[0, 1].set(nets[1]["b_out"][0])
    b_rows.append(b_out)
    slab_b = jnp.concatenate(b_rows, axis=0)             # (513, 128)

    return slab_a, slab_b


# ---------------------------- pure-JAX ref ---------------------------------
def _ref_forward(state, action, nets):
    if action.ndim == 1:
        action = action[:, None]
    sa = jnp.concatenate([state, action], axis=1)
    outs = []
    for n in nets:
        x = jax.nn.relu(sa @ n["w_in"] + n["b_in"])
        for l in range(NUM_HIDDEN_LAYERS):
            xc = jnp.concatenate([x, sa], axis=1)
            x = jax.nn.relu(xc @ n["w_h"][l] + n["b_h"][l])
        outs.append(x @ n["w_out"] + n["b_out"])
    return outs[0], outs[1]


# -------------------------------- main --------------------------------------
if __name__ == "__main__":
    key = jax.random.PRNGKey(0)
    k_params, k_state, k_action = jax.random.split(key, 3)

    nets = init_critic_params(k_params)
    slab_a, slab_b = fuse_params(nets)
    state = jax.random.normal(k_state, (BATCH, OBS_SIZE), jnp.float32)
    action = jax.random.normal(k_action, (BATCH, ACT_SIZE), jnp.float32)

    q1, q2 = critic_forward(state, action, slab_a, slab_b)
    jax.block_until_ready((q1, q2))

    r1, r2 = _ref_forward(state, action, nets)
    assert q1.shape == (BATCH, 1) and q2.shape == (BATCH, 1)
    assert jnp.allclose(q1, r1, atol=1e-5, rtol=1e-5)
    assert jnp.allclose(q2, r2, atol=1e-5, rtol=1e-5)

    print("KERNEL_OK")
</pallas_src>

<mosaic_0001>
module attributes {stable_mosaic.version = 11 : i64} {
  func.func @critic_kernel(%arg0: i32, %arg1: memref<8x24xf32, #tpu.memory_space<vmem>>, %arg2: memref<8x8xf32, #tpu.memory_space<vmem>>, %arg3: memref<33x512xf32, #tpu.memory_space<vmem>>, %arg4: memref<513x128xf32, #tpu.memory_space<vmem>>, %arg5: memref<8x2xf32, #tpu.memory_space<vmem>>) attributes {dimension_semantics = [#tpu.dimension_semantics<parallel>], iteration_bounds = array<i64: 1>, scalar_prefetch = 0 : i64, scratch_operands = 0 : i64, tpu.core_type = #tpu.core_type<tc>, window_params = [{transform_indices = @transform_0, window_bounds = array<i64: 8, 24>}, {transform_indices = @transform_1, window_bounds = array<i64: 8, 8>}, {pipeline_mode = #tpu.pipeline_mode<synchronous>, transform_indices = @transform_2, window_bounds = array<i64: 33, 512>}, {pipeline_mode = #tpu.pipeline_mode<synchronous>, transform_indices = @transform_3, window_bounds = array<i64: 513, 128>}, {transform_indices = @transform_4, window_bounds = array<i64: 8, 2>}]} {
    %c0 = arith.constant 0 : index
    %c0_0 = arith.constant 0 : index
    %0 = vector.load %arg1[%c0, %c0_0] : memref<8x24xf32, #tpu.memory_space<vmem>>, vector<8x24xf32>
    %c0_1 = arith.constant 0 : index
    %c0_2 = arith.constant 0 : index
    %1 = vector.load %arg3[%c0_1, %c0_2] : memref<33x512xf32, #tpu.memory_space<vmem>>, vector<24x512xf32>
    %cst = arith.constant dense<0.000000e+00> : vector<8x512xf32>
    %2 = tpu.matmul %0, %1, %cst {dimension_numbers = #tpu.dot_dimension_numbers<[1], [0], [0], [1], [0, 0, 1, 1], [], []>} : vector<8x24xf32>, vector<24x512xf32>, vector<8x512xf32> -> vector<8x512xf32>
    %c0_3 = arith.constant 0 : index
    %c0_4 = arith.constant 0 : index
    %3 = vector.load %arg2[%c0_3, %c0_4] : memref<8x8xf32, #tpu.memory_space<vmem>>, vector<8x8xf32>
    %c24 = arith.constant 24 : index
    %c0_5 = arith.constant 0 : index
    %4 = vector.load %arg3[%c24, %c0_5] : memref<33x512xf32, #tpu.memory_space<vmem>>, vector<8x512xf32>
    %cst_6 = arith.constant dense<0.000000e+00> : vector<8x512xf32>
    %5 = tpu.matmul %3, %4, %cst_6 {dimension_numbers = #tpu.dot_dimension_numbers<[1], [0], [0], [1], [0, 0, 1, 1], [], []>} : vector<8x8xf32>, vector<8x512xf32>, vector<8x512xf32> -> vector<8x512xf32>
    %6 = arith.addf %2, %5 : vector<8x512xf32>
    %c32 = arith.constant 32 : index
    %c0_7 = arith.constant 0 : index
    %7 = vector.load %arg3[%c32, %c0_7] : memref<33x512xf32, #tpu.memory_space<vmem>>, vector<1x512xf32>
    %8 = vector.broadcast %7 : vector<1x512xf32> to vector<8x512xf32>
    %9 = arith.addf %6, %8 : vector<8x512xf32>
    %10 = vector.extract_strided_slice %9 {offsets = [0, 0], sizes = [8, 128], strides = [1, 1]} : vector<8x512xf32> to vector<8x128xf32>
    %cst_8 = arith.constant 0.000000e+00 : f32
    %11 = vector.broadcast %cst_8 : f32 to vector<8x128xf32>
    %12 = arith.maximumf %10, %11 : vector<8x128xf32>
    %c0_9 = arith.constant 0 : index
    %c0_10 = arith.constant 0 : index
    %13 = vector.load %arg4[%c0_9, %c0_10] : memref<513x128xf32, #tpu.memory_space<vmem>>, vector<128x128xf32>
    %cst_11 = arith.constant dense<0.000000e+00> : vector<8x128xf32>
    %14 = tpu.matmul %12, %13, %cst_11 {dimension_numbers = #tpu.dot_dimension_numbers<[1], [0], [0], [1], [0, 0, 1, 1], [], []>} : vector<8x128xf32>, vector<128x128xf32>, vector<8x128xf32> -> vector<8x128xf32>
    %15 = vector.extract_strided_slice %9 {offsets = [0, 128], sizes = [8, 128], strides = [1, 1]} : vector<8x512xf32> to vector<8x128xf32>
    %16 = arith.addf %14, %15 : vector<8x128xf32>
    %cst_12 = arith.constant 0.000000e+00 : f32
    %17 = vector.broadcast %cst_12 : f32 to vector<8x128xf32>
    %18 = arith.maximumf %16, %17 : vector<8x128xf32>
    %c128 = arith.constant 128 : index
    %c0_13 = arith.constant 0 : index
    %19 = vector.load %arg4[%c128, %c0_13] : memref<513x128xf32, #tpu.memory_space<vmem>>, vector<128x128xf32>
    %cst_14 = arith.constant dense<0.000000e+00> : vector<8x128xf32>
    %20 = tpu.matmul %18, %19, %cst_14 {dimension_numbers = #tpu.dot_dimension_numbers<[1], [0], [0], [1], [0, 0, 1, 1], [], []>} : vector<8x128xf32>, vector<128x128xf32>, vector<8x128xf32> -> vector<8x128xf32>
    %21 = vector.extract_strided_slice %9 {offsets = [0, 256], sizes = [8, 128], strides = [1, 1]} : vector<8x512xf32> to vector<8x128xf32>
    %22 = arith.addf %20, %21 : vector<8x128xf32>
    %cst_15 = arith.constant 0.000000e+00 : f32
    %23 = vector.broadcast %cst_15 : f32 to vector<8x128xf32>
    %24 = arith.maximumf %22, %23 : vector<8x128xf32>
    %c256 = arith.constant 256 : index
    %c0_16 = arith.constant 0 : index
    %25 = vector.load %arg4[%c256, %c0_16] : memref<513x128xf32, #tpu.memory_space<vmem>>, vector<128x128xf32>
    %cst_17 = arith.constant dense<0.000000e+00> : vector<8x128xf32>
    %26 = tpu.matmul %24, %25, %cst_17 {dimension_numbers = #tpu.dot_dimension_numbers<[1], [0], [0], [1], [0, 0, 1, 1], [], []>} : vector<8x128xf32>, vector<128x128xf32>, vector<8x128xf32> -> vector<8x128xf32>
    %27 = vector.extract_strided_slice %9 {offsets = [0, 384], sizes = [8, 128], strides = [1, 1]} : vector<8x512xf32> to vector<8x128xf32>
    %28 = arith.addf %26, %27 : vector<8x128xf32>
    %cst_18 = arith.constant 0.000000e+00 : f32
    %29 = vector.broadcast %cst_18 : f32 to vector<8x128xf32>
    %30 = arith.maximumf %28, %29 : vector<8x128xf32>
    %c384 = arith.constant 384 : index
    %c0_19 = arith.constant 0 : index
    %31 = vector.load %arg4[%c384, %c0_19] : memref<513x128xf32, #tpu.memory_space<vmem>>, vector<128x128xf32>
    %c512 = arith.constant 512 : index
    %c0_20 = arith.constant 0 : index
    %32 = vector.load %arg4[%c512, %c0_20] : memref<513x128xf32, #tpu.memory_space<vmem>>, vector<1x128xf32>
    %cst_21 = arith.constant dense<0.000000e+00> : vector<8x128xf32>
    %33 = tpu.matmul %30, %31, %cst_21 {dimension_numbers = #tpu.dot_dimension_numbers<[1], [0], [0], [1], [0, 0, 1, 1], [], []>} : vector<8x128xf32>, vector<128x128xf32>, vector<8x128xf32> -> vector<8x128xf32>
    %34 = vector.broadcast %32 : vector<1x128xf32> to vector<8x128xf32>
    %35 = arith.addf %33, %34 : vector<8x128xf32>
    %36 = vector.extract_strided_slice %35 {offsets = [0, 0], sizes = [8, 2], strides = [1, 1]} : vector<8x128xf32> to vector<8x2xf32>
    %c0_22 = arith.constant 0 : index
    %c0_23 = arith.constant 0 : index
    %37 = vector.load %arg5[%c0_22, %c0_23] : memref<8x2xf32, #tpu.memory_space<vmem>>, vector<8x2xf32>
    tpu.vector_store %arg5[%c0_22, %c0_23], %36 {strides = array<i32>} : memref<8x2xf32, #tpu.memory_space<vmem>>, vector<8x2xf32>,
    return
  }
  func.func @transform_0(%arg0: i32) -> (i32, i32) {
    %c0_i32 = arith.constant 0 : i32
    %c0_i32_0 = arith.constant 0 : i32
    return %arg0, %c0_i32 : i32, i32
  }
  func.func @transform_1(%arg0: i32) -> (i32, i32) {
    %c0_i32 = arith.constant 0 : i32
    %c0_i32_0 = arith.constant 0 : i32
    return %arg0, %c0_i32 : i32, i32
  }
  func.func @transform_2(%arg0: i32) -> (i32, i32) {
    %c0_i32 = arith.constant 0 : i32
    %c0_i32_0 = arith.constant 0 : i32
    %c0_i32_1 = arith.constant 0 : i32
    return %c0_i32, %c0_i32_0 : i32, i32
  }
  func.func @transform_3(%arg0: i32) -> (i32, i32) {
    %c0_i32 = arith.constant 0 : i32
    %c0_i32_0 = arith.constant 0 : i32
    %c0_i32_1 = arith.constant 0 : i32
    return %c0_i32, %c0_i32_0 : i32, i32
  }
  func.func @transform_4(%arg0: i32) -> (i32, i32) {
    %c0_i32 = arith.constant 0 : i32
    %c0_i32_0 = arith.constant 0 : i32
    return %arg0, %c0_i32 : i32, i32
  }
}

</mosaic_0001>

<bundles_post_ra>
// kernel: critic_forward.1
= control target key start
LH: loop header
LB: loop body
LE: loop exit
PB: predicated region body
PF: predicated region fallthrough
CT: control target
= control target key end

     0   :  { %9 = vsyncpa [#allocation3], 0  ;;  %s1226_s0 = inlined_call_operand.hbm [shape: f32[8,24], index: 0, kind: input, shape index: {}]   ;;  %s1227_s1 = inlined_call_operand.hbm [shape: f32[8,8], index: 1, kind: input, shape index: {}]   ;;  %s1228_s2 = inlined_call_operand.hbm [shape: f32[33,512], index: 2, kind: input, shape index: {}]   ;;  %s1229_s3 = inlined_call_operand.hbm [shape: f32[513,128], index: 3, kind: input, shape index: {}]   ;;  %s1230_s4 = inlined_call_operand.vmem [shape: f32[8,2], index: 4, kind: output, shape index: {}]  }
   0x1   :  { %10 = vsyncpa [#allocation5], 0 }
   0x2   :  { %11 = vsyncpa [#allocation8], 0  ;;  %s1076_s15 = smov [#allocation4]   ;;  %s1077_s17 = smov [#allocation2]  }
   0x3   :  { %s28_s16 = sshll.u32 %s1076_s15, 4  ;;  %s18_s18 = sshll.u32 %s1077_s17, 4  ;;  %s29_s16 = int_to_ptr.vmem [resolvable:$true] %s28_s16  ;;  %s19_s18 = int_to_ptr.vmem [resolvable:$true] %s18_s18 }
   0x4   :  { %s998_s19 = scalar_lea.vmem %s29_s16, 128  ;;  %p1003_p1 = scmp.lt.s32.totalorder %s29_s16, %s29_s16 }
   0x5   :  { %p999_p0 = scmp.ne.s32.totalorder %s29_s16, %s998_s19  ;;  %p1004_p2 = scmp.lt.s32.totalorder %s998_s19, %s998_s19 }
   0x7   :  { %p1005_p3 = por %p1004_p2, %p1003_p1 }
   0x9   :  { %p1006_p4 = pnand %p1005_p3, %p999_p0 }
   0xb   :  { %1009 = shalt.err (!%p1006_p4)
}
   0xc   :  { %31 = dma.hbm_to_vmem [thread:$0]  %s1227_s1, 128, %s29_s16, [#allocation5]  }
   0xd   :  { %s1018_s22 = scalar_lea.vmem %s19_s18, 128  ;;  %p1023_p6 = scmp.lt.s32.totalorder %s19_s18, %s19_s18 }
   0xe   :  { %p1019_p5 = scmp.ne.s32.totalorder %s19_s18, %s1018_s22  ;;  %p1024_p7 = scmp.lt.s32.totalorder %s1018_s22, %s1018_s22 }
  0x10   :  { %p1025_p8 = por %p1024_p7, %p1023_p6 }
  0x12   :  { %p1026_p9 = pnand %p1025_p8, %p1019_p5 }
  0x14   :  { %1029 = shalt.err (!%p1026_p9)
}
  0x15   :  { %21 = dma.hbm_to_vmem [thread:$0]  %s1226_s0, 128, %s19_s18, [#allocation3]  }
  0x16   :  { %s1078_s25 = smov [#allocation6]  }
  0x17   :  { %s37_s26 = sshll.u32 %s1078_s25, 4  ;;  %s38_s26 = int_to_ptr.vmem [resolvable:$true] %s37_s26 }
  0x18   :  { %s1038_s27 = scalar_lea.vmem %s38_s26, 2560  ;;  %p1043_p11 = scmp.lt.s32.totalorder %s38_s26, %s38_s26 }
  0x19   :  { %p1039_p10 = scmp.ne.s32.totalorder %s38_s26, %s1038_s27  ;;  %p1044_p12 = scmp.lt.s32.totalorder %s1038_s27, %s1038_s27 }
  0x1b   :  { %p1045_p13 = por %p1044_p12, %p1043_p11 }
  0x1d   :  { %p1046_p0 = pnand %p1045_p13, %p1039_p10 }
  0x1f   :  { %1049 = shalt.err (!%p1046_p0)
}
  0x20   :  { %s1079_s1 = smov 512   ;;  %s1080_s28 = smov 32  }
  0x21   :  { %43 = dma.hbm_to_vmem [thread:$0]  %s1228_s2, 2560, %s38_s26, [#allocation5], %s1079_s1, %s1079_s1, %s1080_s28  }
  0x22   :  { %s1081_s5 = smov [#allocation7]  }
  0x23   :  { %s49_s6 = sshll.u32 %s1081_s5, 4  ;;  %s50_s6 = int_to_ptr.vmem [resolvable:$true] %s49_s6 }
  0x24   :  { %s1058_s0 = scalar_lea.vmem %s50_s6, 8320  ;;  %p1063_p2 = scmp.lt.s32.totalorder %s50_s6, %s50_s6 }
  0x25   :  { %p1059_p1 = scmp.ne.s32.totalorder %s50_s6, %s1058_s0  ;;  %p1064_p3 = scmp.lt.s32.totalorder %s1058_s0, %s1058_s0 }
  0x27   :  { %p1065_p4 = por %p1064_p3, %p1063_p2 }
  0x29   :  { %p1066_p5 = pnand %p1065_p4, %p1059_p1 }
  0x2b   :  { %1069 = shalt.err (!%p1066_p5)
}
  0x2c   :  { %s1082_s7 = smov 128   ;;  %s1083_s8 = smov 8  }
  0x2d   :  { %55 = dma.hbm_to_vmem [thread:$0]  %s1229_s3, 8320, %s50_s6, [#allocation8], %s1082_s7, %s1082_s7, %s1083_s8  }
  0x2e   :  { %1070 = dma.done.wait [#allocation3], 128  }
  0x2f   :  { %1071 = vsyncadd [#allocation3], 4294967168 }
  0x30   :  { %1072 = dma.done.wait [#allocation5], 2688  }
  0x31   :  { %1073 = vsyncadd [#allocation5], 4294964608 }
  0x32   :  { %1074 = dma.done.wait [#allocation8], 8320  }
  0x33   :  { %1075 = vsyncadd [#allocation8], 4294958976  ;;  %v1084_v0 = vmov 0.0   ;;  %v83_v1 = vld [vmem:[#allocation6 + $0x68] sm:$0xff]  ;;  %v82_v2 = vld [vmem:[#allocation6 + $0x60] sm:$0xff]  ;;  %vm86_vm0 = vcmask 64512   ;;  %v381_v48 = vlaneseq }
  0x34   :  { %154 = vmatprep.mubr.f32.mxu0 %v1084_v0  ;;  %225 = vmatprep.mubr.f32.mxu1 %v1084_v0  ;;  %v1125_v3 = vld [vmem:[#allocation4] sm:$0xff]  ;;  %v78_v4 = vld [vmem:[#allocation6 + $0x48] sm:$0xff]  ;;  %v77_v5 = vld [vmem:[#allocation6 + $0x40] sm:$0xff]  ;;  %vm232_vm1 = vcmask 195584   ;;  %vm1085_vm2 = vmmov 0   ;;  %vm758_vm3 = vcmask 15360  }
  0x35   :  { %120 = vmatprep.subr.mxu0 %v83_v1  ;;  %v74_v6 = vld [vmem:[#allocation6 + $0x28] sm:$0xff]  ;;  %v73_v7 = vld [vmem:[#allocation6 + $0x20] sm:$0xff]  ;;  %v1130_v10 = vld [vmem:[#allocation2] sm:$0xff]  ;;  %v1174_v49 = vshrl.u32 %v381_v48, 7 }
  0x36   :  { %121 = vmatpush1.msra.mxu0 %v82_v2  ;;  %v70_v8 = vld [vmem:[#allocation6 + $0x8] sm:$0xff]  ;;  %v69_v9 = vld [vmem:[#allocation6] sm:$0xff]  ;;  %v421_v11 = vld [vmem:[#allocation7 + $0x78] sm:$0xff] }
  0x37   :  { %767 = vmatmul.mubr.msk.f32.vlgmr.msra.gmra.mxu0 %vm86_vm0, %v1125_v3  ;;  %262 = vmatprep.subr.mxu0 %v78_v4  ;;  %v420_v12 = vld [vmem:[#allocation7 + $0x70] sm:$0xff]  ;;  %v419_v13 = vld [vmem:[#allocation7 + $0x68] sm:$0xff]  ;;  %v418_v14 = vld [vmem:[#allocation7 + $0x60] sm:$0xff]  ;;  %v383_v51 = vsub.s32 0, %v1174_v49 }
  0x38   :  { %263 = vmatpush1.msra.mxu0 %v77_v5  ;;  %300 = vmatprep.mubr.f32.mxu0 %v1084_v0  ;;  %v417_v15 = vld [vmem:[#allocation7 + $0x58] sm:$0xff]  ;;  %v416_v16 = vld [vmem:[#allocation7 + $0x50] sm:$0xff]  ;;  %v415_v17 = vld [vmem:[#allocation7 + $0x48] sm:$0xff] }
  0x39   :  { %264 = vmatprep.subr.mxu0 %v74_v6  ;;  %v414_v18 = vld [vmem:[#allocation7 + $0x40] sm:$0xff]  ;;  %v413_v19 = vld [vmem:[#allocation7 + $0x38] sm:$0xff]  ;;  %v412_v20 = vld [vmem:[#allocation7 + $0x30] sm:$0xff] }
  0x3a   :  { %265 = vmatpush1.msra.mxu0 %v73_v7  ;;  %v411_v21 = vld [vmem:[#allocation7 + $0x28] sm:$0xff]  ;;  %v410_v22 = vld [vmem:[#allocation7 + $0x20] sm:$0xff]  ;;  %v409_v23 = vld [vmem:[#allocation7 + $0x18] sm:$0xff] }
  0x3b   :  { %266 = vmatprep.subr.mxu0 %v70_v8  ;;  %v408_v24 = vld [vmem:[#allocation7 + $0x10] sm:$0xff]  ;;  %v407_v25 = vld [vmem:[#allocation7 + $0x8] sm:$0xff]  ;;  %v406_v26 = vld [vmem:[#allocation7] sm:$0xff] }
  0x3c   :  { %267 = vmatpush1.msra.mxu0 %v69_v9  ;;  %v85_v27 = vld [vmem:[#allocation6 + $0x78] sm:$0xff]  ;;  %v84_v28 = vld [vmem:[#allocation6 + $0x70] sm:$0xff]  ;;  %v506_v37 = vld [vmem:[#allocation7 + $0xe8] sm:$0xff] }
  0x3d   :  { %769 = vmatmul.mubr.msk.f32.vlgmr.msra.gmra.mxu0 %vm232_vm1, %v1130_v10  ;;  %840 = vmatprep.subr.mxu0 %v1084_v0  ;;  %v80_v29 = vld [vmem:[#allocation6 + $0x58] sm:$0xff]  ;;  %v79_v30 = vld [vmem:[#allocation6 + $0x50] sm:$0xff]  ;;  %v505_v38 = vld [vmem:[#allocation7 + $0xe0] sm:$0xff] }
  0x3e   :  { %841 = vmatpush3.msra.mxu0 %v421_v11  ;;  %872 = vmatprep.mubr.msk.f32.mxu0 %vm1085_vm2, %v1084_v0  ;;  %v76_v31 = vld [vmem:[#allocation6 + $0x38] sm:$0xff]  ;;  %v75_v32 = vld [vmem:[#allocation6 + $0x30] sm:$0xff]  ;;  %v502_v41 = vld [vmem:[#allocation7 + $0xc8] sm:$0xff] }
  0x3f   :  { %842 = vmatprep.subr.mxu0 %v1084_v0  ;;  %191 = vmatprep.subr.mxu1 %v85_v27  ;;  %v72_v33 = vld [vmem:[#allocation6 + $0x18] sm:$0xff]  ;;  %v71_v34 = vld [vmem:[#allocation6 + $0x10] sm:$0xff]  ;;  %v501_v42 = vld [vmem:[#allocation7 + $0xc0] sm:$0xff] }
  0x40   :  { %843 = vmatpush3.msra.mxu0 %v420_v12  ;;  %192 = vmatpush1.msra.mxu1 %v84_v28  ;;  %v508_v35 = vld [vmem:[#allocation7 + $0xf8] sm:$0xff]  ;;  %v507_v36 = vld [vmem:[#allocation7 + $0xf0] sm:$0xff]  ;;  %v498_v45 = vld [vmem:[#allocation7 + $0xa8] sm:$0xff]  ;;  %v387_v12 = vsub.s32 1, %v1174_v49 }
  0x41   :  { %844 = vmatprep.subr.mxu0 %v1084_v0  ;;  %333 = vmatprep.subr.mxu1 %v80_v29  ;;  %v504_v39 = vld [vmem:[#allocation7 + $0xd8] sm:$0xff]  ;;  %v503_v40 = vld [vmem:[#allocation7 + $0xd0] sm:$0xff]  ;;  %v497_v46 = vld [vmem:[#allocation7 + $0xa0] sm:$0xff] }
  0x42   :  { %845 = vmatpush3.msra.mxu0 %v419_v13  ;;  %768 = vmatmul.mubr.msk.f32.vlgmr.msra.gmra.mxu1 %vm86_vm0, %v1125_v3  ;;  %v500_v43 = vld [vmem:[#allocation7 + $0xb8] sm:$0xff]  ;;  %v499_v44 = vld [vmem:[#allocation7 + $0xb0] sm:$0xff]  ;;  %v494_v60 = vld [vmem:[#allocation7 + $0x88] sm:$0xff] }
  0x43   :  { %846 = vmatprep.subr.mxu0 %v1084_v0  ;;  %334 = vmatpush1.msra.mxu1 %v79_v30  ;;  %v496_v47 = vld [vmem:[#allocation7 + $0x98] sm:$0xff]  ;;  %v495_v59 = vld [vmem:[#allocation7 + $0x90] sm:$0xff]  ;;  %v493_v61 = vld [vmem:[#allocation7 + $0x80] sm:$0xff] }
  0x44   :  { %847 = vmatpush3.msra.mxu0 %v418_v14  ;;  %371 = vmatprep.mubr.f32.mxu1 %v1084_v0  ;;  %v1177_v52 = vld [vmem:[#allocation6 + $0x80] ss:$8 sm:$0xf] }
  0x45   :  { %848 = vmatprep.subr.mxu0 %v1084_v0  ;;  %335 = vmatprep.subr.mxu1 %v76_v31  ;;  %v384_v54 = vrot.slane %v1177_v52, %v383_v51  ;;  %v595_v62 = vld [vmem:[#allocation7 + $0x178] sm:$0xff]  ;;  %v594_v63 = vld [vmem:[#allocation7 + $0x170] sm:$0xff]  ;;  %v593_v1 = vld [vmem:[#allocation7 + $0x168] sm:$0xff] }
  0x46   :  { %849 = vmatpush3.msra.mxu0 %v417_v15  ;;  %336 = vmatpush1.msra.mxu1 %v75_v32  ;;  %v592_v2 = vld [vmem:[#allocation7 + $0x160] sm:$0xff]  ;;  %v591_v3 = vld [vmem:[#allocation7 + $0x158] sm:$0xff]  ;;  %v590_v4 = vld [vmem:[#allocation7 + $0x150] sm:$0xff]  ;;  %v388_v15 = vrot.slane %v1177_v52, %v387_v12 }
  0x47   :  { %850 = vmatprep.subr.mxu0 %v1084_v0  ;;  %337 = vmatprep.subr.mxu1 %v72_v33  ;;  %v589_v5 = vld [vmem:[#allocation7 + $0x148] sm:$0xff]  ;;  %v588_v6 = vld [vmem:[#allocation7 + $0x140] sm:$0xff]  ;;  %v587_v7 = vld [vmem:[#allocation7 + $0x138] sm:$0xff] }
  0x48   :  { %851 = vmatpush3.msra.mxu0 %v416_v16  ;;  %338 = vmatpush1.msra.mxu1 %v71_v34  ;;  %v586_v8 = vld [vmem:[#allocation7 + $0x130] sm:$0xff]  ;;  %v585_v9 = vld [vmem:[#allocation7 + $0x128] sm:$0xff]  ;;  %v583_v11 = vld [vmem:[#allocation7 + $0x118] sm:$0xff] }
  0x49   :  { %852 = vmatprep.subr.mxu0 %v1084_v0  ;;  %770 = vmatmul.mubr.msk.f32.vlgmr.msra.gmra.mxu1 %vm232_vm1, %v1130_v10  ;;  %v584_v10 = vld [vmem:[#allocation7 + $0x120] sm:$0xff]  ;;  %v678_v28 = vld [vmem:[#allocation7 + $0x1d8] sm:$0xff]  ;;  %v677_v29 = vld [vmem:[#allocation7 + $0x1d0] sm:$0xff] }
  0x4a   :  { %853 = vmatpush3.msra.mxu0 %v415_v17  ;;  %875 = vmatprep.subr.mxu1 %v1084_v0  ;;  %v679_v27 = vld [vmem:[#allocation7 + $0x1e0] sm:$0xff]  ;;  %v676_v30 = vld [vmem:[#allocation7 + $0x1c8] sm:$0xff]  ;;  %v674_v32 = vld [vmem:[#allocation7 + $0x1b8] sm:$0xff] }
  0x4b   :  { %854 = vmatprep.subr.mxu0 %v1084_v0  ;;  %876 = vmatpush3.msra.mxu1 %v508_v35  ;;  %v675_v31 = vld [vmem:[#allocation7 + $0x1c0] sm:$0xff]  ;;  %v673_v33 = vld [vmem:[#allocation7 + $0x1b0] sm:$0xff]  ;;  %v672_v34 = vld [vmem:[#allocation7 + $0x1a8] sm:$0xff] }
  0x4c   :  { %855 = vmatpush3.msra.mxu0 %v414_v18  ;;  %907 = vmatprep.mubr.msk.f32.mxu1 %vm1085_vm2, %v1084_v0  ;;  %v671_v35 = vld [vmem:[#allocation7 + $0x1a0] sm:$0xff]  ;;  %v668_v51 = vld [vmem:[#allocation7 + $0x188] sm:$0xff] }
  0x4d   :  { %856 = vmatprep.subr.mxu0 %v1084_v0  ;;  %877 = vmatprep.subr.mxu1 %v1084_v0 }
  0x4e   :  { %857 = vmatpush3.msra.mxu0 %v413_v19  ;;  %878 = vmatpush3.msra.mxu1 %v507_v36  ;;  %v670_v36 = vld [vmem:[#allocation7 + $0x198] sm:$0xff] }
  0x4f   :  { %858 = vmatprep.subr.mxu0 %v1084_v0  ;;  %879 = vmatprep.subr.mxu1 %v1084_v0 }
  0x50   :  { %859 = vmatpush3.msra.mxu0 %v412_v20  ;;  %880 = vmatpush3.msra.mxu1 %v506_v37 }
  0x51   :  { %860 = vmatprep.subr.mxu0 %v1084_v0  ;;  %881 = vmatprep.subr.mxu1 %v1084_v0 }
  0x52   :  { %861 = vmatpush3.msra.mxu0 %v411_v21  ;;  %882 = vmatpush3.msra.mxu1 %v505_v38  ;;  %v582_v21 = vld [vmem:[#allocation7 + $0x110] sm:$0xff] }
  0x53   :  { %862 = vmatprep.subr.mxu0 %v1084_v0  ;;  %883 = vmatprep.subr.mxu1 %v1084_v0 }
  0x54   :  { %863 = vmatpush3.msra.mxu0 %v410_v22  ;;  %884 = vmatpush3.msra.mxu1 %v504_v39  ;;  %v581_v22 = vld [vmem:[#allocation7 + $0x108] sm:$0xff]  ;;  %v391_v39 = vsub.s32 2, %v1174_v49 }
  0x55   :  { %864 = vmatprep.subr.mxu0 %v1084_v0  ;;  %885 = vmatprep.subr.mxu1 %v1084_v0 }
  0x56   :  { %865 = vmatpush3.msra.mxu0 %v409_v23  ;;  %886 = vmatpush3.msra.mxu1 %v503_v40  ;;  %v580_v23 = vld [vmem:[#allocation7 + $0x100] sm:$0xff] }
  0x57   :  { %866 = vmatprep.subr.mxu0 %v1084_v0  ;;  %887 = vmatprep.subr.mxu1 %v1084_v0 }
  0x58   :  { %867 = vmatpush3.msra.mxu0 %v408_v24  ;;  %888 = vmatpush3.msra.mxu1 %v502_v41  ;;  %v682_v24 = vld [vmem:[#allocation7 + $0x1f8] sm:$0xff] }
  0x59   :  { %868 = vmatprep.subr.mxu0 %v1084_v0  ;;  %889 = vmatprep.subr.mxu1 %v1084_v0 }
  0x5a   :  { %869 = vmatpush3.msra.mxu0 %v407_v25  ;;  %890 = vmatpush3.msra.mxu1 %v501_v42  ;;  %v681_v25 = vld [vmem:[#allocation7 + $0x1f0] sm:$0xff]  ;;  %v392_v42 = vrot.slane %v1177_v52, %v391_v39 }
  0x5b   :  { %870 = vmatprep.subr.mxu0 %v1084_v0  ;;  %891 = vmatprep.subr.mxu1 %v1084_v0 }
  0x5c   :  { %871 = vmatpush3.msra.mxu0 %v406_v26  ;;  %892 = vmatpush3.msra.mxu1 %v500_v43  ;;  %v680_v26 = vld [vmem:[#allocation7 + $0x1e8] sm:$0xff] }
  0x5d   :  { %910 = vmatprep.subr.mxu0 %v1084_v0  ;;  %893 = vmatprep.subr.mxu1 %v1084_v0 }
  0x5e   :  { %894 = vmatpush3.msra.mxu1 %v499_v44 }
  0x5f   :  { %895 = vmatprep.subr.mxu1 %v1084_v0 }
  0x60   :  { %896 = vmatpush3.msra.mxu1 %v498_v45 }
  0x61   :  { %897 = vmatprep.subr.mxu1 %v1084_v0 }
  0x62   :  { %898 = vmatpush3.msra.mxu1 %v497_v46 }
  0x63   :  { %899 = vmatprep.subr.mxu1 %v1084_v0 }
  0x64   :  { %900 = vmatpush3.msra.mxu1 %v496_v47 }
  0x65   :  { %901 = vmatprep.subr.mxu1 %v1084_v0 }
  0x66   :  { %902 = vmatpush3.msra.mxu1 %v495_v59 }
  0x67   :  { %903 = vmatprep.subr.mxu1 %v1084_v0 }
  0x68   :  { %904 = vmatpush3.msra.mxu1 %v494_v60 }
  0x69   :  { %905 = vmatprep.subr.mxu1 %v1084_v0 }
  0x6a   :  { %906 = vmatpush3.msra.mxu1 %v493_v61 }
  0x6b   :  { %945 = vmatprep.subr.mxu1 %v1084_v0 }
  0xf7   :  { %v156_v50 = vpop.f32.mrf.mxu0 }
  0xf9   :  { %v158_v53 = vpop.f32.mrf.mxu0 }
  0xfd   :  { %v302_v55 = vpop.f32.mrf.mxu0 }
  0xfe   :  { %v303_v56 = vadd.f32 %v302_v55, %v156_v50  ;;  %v669_v50 = vld [vmem:[#allocation7 + $0x190] sm:$0xff] }
  0xff   :  { %v304_v13 = vpop.f32.mrf.mxu0 }
 0x100   :  { %v401_v57 = vadd.f32 %v384_v54, %v303_v56  ;;  %v305_v14 = vadd.f32 %v304_v13, %v158_v53  ;;  %v667_v53 = vld [vmem:[#allocation7 + $0x180] sm:$0xff]  ;;  %v395_v54 = vsub.s32 3, %v1174_v49 }
 0x102   :  { %v405_v58 = vmax.f32 %v401_v57, 0.0  ;;  %v402_v16 = vadd.f32 %v388_v15, %v305_v14  ;;  %v227_v37 = vpop.f32.mrf.mxu1  ;;  %v396_v56 = vrot.slane %v1177_v52, %v395_v54 }
 0x104   :  { %873 = vmatmul.mubr.f32.vlgmr.msra.gmra.mxu0 %v405_v58  ;;  %v229_v38 = vpop.f32.mrf.mxu1 }
 0x105   :  { %942 = vmatprep.mubr.msk.f32.mxu0 %vm1085_vm2, %v1084_v0  ;;  %911 = vmatpush3.msra.mxu0 %v595_v62  ;;  %v771_v62 = vld [vmem:[#allocation7 + $0x200] ss:$0 sm:$0xff] }
 0x106   :  { %912 = vmatprep.subr.mxu0 %v1084_v0 }
 0x107   :  { %913 = vmatpush3.msra.mxu0 %v594_v63 }
 0x108   :  { %914 = vmatprep.subr.mxu0 %v1084_v0 }
 0x109   :  { %915 = vmatpush3.msra.mxu0 %v593_v1  ;;  %v373_v40 = vpop.f32.mrf.mxu1 }
 0x10a   :  { %916 = vmatprep.subr.mxu0 %v1084_v0  ;;  %v374_v41 = vadd.f32 %v373_v40, %v227_v37 }
 0x10b   :  { %917 = vmatpush3.msra.mxu0 %v592_v2  ;;  %v375_v43 = vpop.f32.mrf.mxu1 }
 0x10c   :  { %918 = vmatprep.subr.mxu0 %v1084_v0  ;;  %v403_v44 = vadd.f32 %v392_v42, %v374_v41  ;;  %v376_v55 = vadd.f32 %v375_v43, %v229_v38 }
 0x10d   :  { %919 = vmatpush3.msra.mxu0 %v591_v3 }
 0x10e   :  { %920 = vmatprep.subr.mxu0 %v1084_v0  ;;  %v404_v57 = vadd.f32 %v396_v56, %v376_v55 }
 0x10f   :  { %921 = vmatpush3.msra.mxu0 %v590_v4 }
 0x110   :  { %922 = vmatprep.subr.mxu0 %v1084_v0 }
 0x111   :  { %923 = vmatpush3.msra.mxu0 %v589_v5 }
 0x112   :  { %924 = vmatprep.subr.mxu0 %v1084_v0 }
 0x113   :  { %925 = vmatpush3.msra.mxu0 %v588_v6 }
 0x114   :  { %926 = vmatprep.subr.mxu0 %v1084_v0 }
 0x115   :  { %927 = vmatpush3.msra.mxu0 %v587_v7 }
 0x116   :  { %928 = vmatprep.subr.mxu0 %v1084_v0 }
 0x117   :  { %929 = vmatpush3.msra.mxu0 %v586_v8 }
 0x118   :  { %930 = vmatprep.subr.mxu0 %v1084_v0 }
 0x119   :  { %931 = vmatpush3.msra.mxu0 %v585_v9 }
 0x11a   :  { %932 = vmatprep.subr.mxu0 %v1084_v0 }
 0x11b   :  { %933 = vmatpush3.msra.mxu0 %v584_v10 }
 0x11c   :  { %934 = vmatprep.subr.mxu0 %v1084_v0 }
 0x11d   :  { %935 = vmatpush3.msra.mxu0 %v583_v11 }
 0x11e   :  { %936 = vmatprep.subr.mxu0 %v1084_v0 }
 0x11f   :  { %937 = vmatpush3.msra.mxu0 %v582_v21 }
 0x120   :  { %938 = vmatprep.subr.mxu0 %v1084_v0 }
 0x121   :  { %939 = vmatpush3.msra.mxu0 %v581_v22 }
 0x122   :  { %940 = vmatprep.subr.mxu0 %v1084_v0 }
 0x123   :  { %941 = vmatpush3.msra.mxu0 %v580_v23 }
 0x1c4   :  { %v488_v17 = vpop.f32.mrf.mxu0 }
 0x1c5   :  { %v489_v18 = vadd.f32 %v488_v17, %v402_v16 }
 0x1c6   :  { %v874_v19 = vpop.f32.mrf.mxu0 }
 0x1c7   :  { %v492_v20 = vmax.f32 %v489_v18, 0.0 }
 0x1c9   :  { %908 = vmatmul.mubr.f32.vlgmr.msra.gmra.mxu1 %v492_v20 }
 0x1ca   :  { %977 = vmatprep.mubr.msk.f32.mxu1 %vm1085_vm2, %v1084_v0  ;;  %946 = vmatpush3.msra.mxu1 %v682_v24 }
 0x1cb   :  { %947 = vmatprep.subr.mxu1 %v1084_v0 }
 0x1cc   :  { %948 = vmatpush3.msra.mxu1 %v681_v25 }
 0x1cd   :  { %949 = vmatprep.subr.mxu1 %v1084_v0 }
 0x1ce   :  { %950 = vmatpush3.msra.mxu1 %v680_v26 }
 0x1cf   :  { %951 = vmatprep.subr.mxu1 %v1084_v0 }
 0x1d0   :  { %952 = vmatpush3.msra.mxu1 %v679_v27 }
 0x1d1   :  { %953 = vmatprep.subr.mxu1 %v1084_v0 }
 0x1d2   :  { %954 = vmatpush3.msra.mxu1 %v678_v28 }
 0x1d3   :  { %955 = vmatprep.subr.mxu1 %v1084_v0 }
 0x1d4   :  { %956 = vmatpush3.msra.mxu1 %v677_v29 }
 0x1d5   :  { %957 = vmatprep.subr.mxu1 %v1084_v0 }
 0x1d6   :  { %958 = vmatpush3.msra.mxu1 %v676_v30 }
 0x1d7   :  { %959 = vmatprep.subr.mxu1 %v1084_v0 }
 0x1d8   :  { %960 = vmatpush3.msra.mxu1 %v675_v31 }
 0x1d9   :  { %961 = vmatprep.subr.mxu1 %v1084_v0 }
 0x1da   :  { %962 = vmatpush3.msra.mxu1 %v674_v32 }
 0x1db   :  { %963 = vmatprep.subr.mxu1 %v1084_v0 }
 0x1dc   :  { %964 = vmatpush3.msra.mxu1 %v673_v33 }
 0x1dd   :  { %965 = vmatprep.subr.mxu1 %v1084_v0 }
 0x1de   :  { %966 = vmatpush3.msra.mxu1 %v672_v34 }
 0x1df   :  { %967 = vmatprep.subr.mxu1 %v1084_v0 }
 0x1e0   :  { %968 = vmatpush3.msra.mxu1 %v671_v35 }
 0x1e1   :  { %969 = vmatprep.subr.mxu1 %v1084_v0 }
 0x1e2   :  { %970 = vmatpush3.msra.mxu1 %v670_v36 }
 0x1e3   :  { %971 = vmatprep.subr.mxu1 %v1084_v0 }
 0x1e4   :  { %972 = vmatpush3.msra.mxu1 %v669_v50 }
 0x1e5   :  { %973 = vmatprep.subr.mxu1 %v1084_v0 }
 0x1e6   :  { %974 = vmatpush3.msra.mxu1 %v668_v51 }
 0x1e7   :  { %975 = vmatprep.subr.mxu1 %v1084_v0 }
 0x1e8   :  { %976 = vmatpush3.msra.mxu1 %v667_v53 }
 0x289   :  { %v575_v45 = vpop.f32.mrf.mxu1 }
 0x28a   :  { %v576_v46 = vadd.f32 %v575_v45, %v403_v44 }
 0x28b   :  { %v909_v47 = vpop.f32.mrf.mxu1 }
 0x28c   :  { %v579_v48 = vmax.f32 %v576_v46, 0.0 }
 0x28e   :  { %943 = vmatmul.mubr.f32.vlgmr.msra.gmra.mxu0 %v579_v48 }
 0x34e   :  { %v662_v58 = vpop.f32.mrf.mxu0 }
 0x34f   :  { %v663_v59 = vadd.f32 %v662_v58, %v404_v57 }
 0x350   :  { %v944_v60 = vpop.f32.mrf.mxu0 }
 0x351   :  { %v666_v61 = vmax.f32 %v663_v59, 0.0 }
 0x353   :  { %978 = vmatmul.mubr.f32.vlgmr.msra.gmra.mxu1 %v666_v61 }
 0x413   :  { %v754_v63 = vpop.f32.mrf.mxu1 }
 0x414   :  { %v755_v1 = vadd.f32 %v771_v62, %v754_v63 }
 0x415   :  { %v979_v2 = vpop.f32.mrf.mxu1 }
 0x416   :  { %759 = vst.msk [vmem:[%s1230_s4] sm:$0xff] %vm758_vm3, %v755_v1 }
 0x417   :  { %764 = vsyncpa [#allocation3], 1 }
 0x418   :  { %765 = vsyncpa [#allocation5], 1 }
 0x419   :  { %766 = vsyncpa [#allocation8], 1 }

</bundles_post_ra>
